<compile_context>
chip_gen: v6e
topology: v6e:2x2x1
jax: 0.10.0
libtpu: 0.0.40
codegen_flags: <defaults>
</compile_context>

<pallas_src>
import math
import functools

import jax
import jax.numpy as jnp
from jax.experimental import pallas as pl
from jax.experimental.pallas import tpu as pltpu


# ----------------------------------------------------------------------------
# PE table construction (glue: buffer setup, plain JAX)
# ----------------------------------------------------------------------------
def make_pe_table(max_len: int, d_model: int, dtype=jnp.float32) -> jnp.ndarray:
    """Sinusoidal positional-encoding table, shape (max_len, d_model)."""
    assert d_model % 2 == 0, "d_model must be even (matches the PyTorch module)"
    position = jnp.arange(max_len, dtype=jnp.float32)[:, None]            # (L, 1)
    div_term = jnp.exp(
        jnp.arange(0, d_model, 2, dtype=jnp.float32) * (-math.log(10000.0) / d_model)
    )                                                                     # (D/2,)
    angles = position * div_term                                          # (L, D/2)
    pe = jnp.zeros((max_len, d_model), jnp.float32)
    pe = pe.at[:, 0::2].set(jnp.sin(angles))
    pe = pe.at[:, 1::2].set(jnp.cos(angles))
    return pe.astype(dtype)


def _dropout_bits(seed: int, shape) -> jnp.ndarray:
    """uint32 random bits for the dropout mask (glue, plain JAX)."""
    return jax.random.bits(jax.random.PRNGKey(seed), shape, dtype=jnp.uint32)


# ----------------------------------------------------------------------------
# Pallas kernels
# ----------------------------------------------------------------------------
def _pe_add_kernel(x_ref, pe_ref, o_ref):
    # x_ref: (tS, B, D), pe_ref: (tS, D) already in x dtype
    o_ref[...] = x_ref[...] + pe_ref[...][:, None, :]


def _pe_add_dropout_kernel(x_ref, pe_ref, bits_ref, o_ref, *, threshold, inv_keep):
    # Inverted dropout: keep iff bits < threshold (threshold = keep_prob * 2^32),
    # scale kept values by 1/keep_prob.  Single compare + single where/mul.
    y = x_ref[...] + pe_ref[...][:, None, :]
    keep = bits_ref[...] < jnp.uint32(threshold)
    scaled = y * jnp.asarray(inv_keep, y.dtype)
    o_ref[...] = jnp.where(keep, scaled, jnp.zeros_like(scaled))


# ----------------------------------------------------------------------------
# Tiling helper
# ----------------------------------------------------------------------------
def _choose_tile_s(S: int, bytes_per_row: int, target_bytes: int = 2 * 1024 * 1024) -> int:
    """Rows per block: ~2 MiB of per-row traffic, multiple of 8 (sublane), <= S.

    Kept conservative so that with default double-buffering the live set stays
    well inside the default scoped VMEM on all generations (v5e 16 MiB,
    v6e/v7x 32 MiB), no vmem_limit override needed.
    """
    if S <= 8:
        return S
    rows = max(8, target_bytes // max(1, bytes_per_row))
    rows = (rows // 8) * 8
    return int(min(S, rows))


# ----------------------------------------------------------------------------
# Wrapper
# ----------------------------------------------------------------------------
class PositionalEncoding:
    """Pallas-backed equivalent of the PyTorch PositionalEncoding module."""

    def __init__(self, d_model: int, dropout: float, max_len: int = 15000):
        self.d_model = d_model
        self.dropout_p = float(dropout)
        self.max_len = max_len
        self.pe = make_pe_table(max_len, d_model)   # (max_len, d_model) buffer

    def __call__(self, x: jnp.ndarray, *, training: bool = False, seed: int = 0):
        S, B, D = x.shape
        assert D == self.d_model and S <= self.max_len

        # Load PE already in the activation dtype (saves HBM traffic + VPU cast).
        pe_slice = self.pe[:S].astype(x.dtype)                       # (S, D)

        use_dropout = training and self.dropout_p > 0.0

        # Per-row HBM traffic: x row + output row (+ uint32 bits row) + pe row.
        itemsize = x.dtype.itemsize
        bytes_per_row = B * D * (2 * itemsize + (4 if use_dropout else 0)) + D * itemsize
        tS = _choose_tile_s(S, bytes_per_row)
        grid = (pl.cdiv(S, tS),)

        # Last two dims of every block equal the full array extents, so the
        # (8,128) tiling rule is satisfied; tS is a multiple of 8 (or == S).
        x_spec = pl.BlockSpec((tS, B, D), lambda i: (i, 0, 0))
        pe_spec = pl.BlockSpec((tS, D), lambda i: (i, 0))
        out_spec = pl.BlockSpec((tS, B, D), lambda i: (i, 0, 0))
        out_shape = jax.ShapeDtypeStruct((S, B, D), x.dtype)

        # "parallel" lets v7x shard grid steps across its two TensorCores;
        # harmless on single-TC v5e/v6e.
        cparams = pltpu.CompilerParams(dimension_semantics=("parallel",))

        if use_dropout:
            keep_prob = 1.0 - self.dropout_p
            threshold = min(int(round(keep_prob * 2.0**32)), 2**32 - 1)
            bits = _dropout_bits(seed, (S, B, D))                    # uint32 mask bits
            kernel = functools.partial(
                _pe_add_dropout_kernel, threshold=threshold, inv_keep=1.0 / keep_prob
            )
            return pl.pallas_call(
                kernel,
                out_shape=out_shape,
                grid=grid,
                in_specs=[
                    x_spec,
                    pe_spec,
                    pl.BlockSpec((tS, B, D), lambda i: (i, 0, 0)),   # bits
                ],
                out_specs=out_spec,
                compiler_params=cparams,
            )(x, pe_slice, bits)
        else:
            # Eval mode: dropout is identity.
            return pl.pallas_call(
                _pe_add_kernel,
                out_shape=out_shape,
                grid=grid,
                in_specs=[x_spec, pe_spec],
                out_specs=out_spec,
                compiler_params=cparams,
            )(x, pe_slice)


# ----------------------------------------------------------------------------
# Demo / self-check
# ----------------------------------------------------------------------------
if __name__ == "__main__":
    key = jax.random.PRNGKey(0)
    # Small but lane-dense shapes: d_model is a multiple of 128 so output
    # stores are unmasked full-lane vst's.
    S, B, D = 8, 2, 128                    # (seq_len, batch, d_model)
    x = jax.random.normal(key, (S, B, D), dtype=jnp.float32)

    module = PositionalEncoding(d_model=D, dropout=0.1, max_len=64)

    # Eval-mode forward (dropout = identity), fully deterministic.
    out = jax.block_until_ready(module(x, training=False))
    ref = x + module.pe[:S][:, None, :].astype(x.dtype)
    assert out.shape == (S, B, D)
    assert jnp.allclose(out, ref, atol=1e-6), "eval mismatch vs reference"

    # Training/dropout path: deterministic given the seed — check exactly
    # against a plain-JAX reference that replays the same mask bits.
    out_train = jax.block_until_ready(module(x, training=True, seed=123))
    keep_prob = 1.0 - module.dropout_p
    threshold = min(int(round(keep_prob * 2.0**32)), 2**32 - 1)
    keep = _dropout_bits(123, (S, B, D)) < jnp.uint32(threshold)
    ref_train = jnp.where(keep, ref * jnp.asarray(1.0 / keep_prob, x.dtype), 0.0)
    assert out_train.shape == (S, B, D)
    assert jnp.allclose(out_train, ref_train, atol=1e-5), "train mismatch vs reference"

    print("KERNEL_OK")
</pallas_src>

<mosaic_0001>
module attributes {stable_mosaic.version = 11 : i64} {
  func.func @_pe_add_kernel(%arg0: i32, %arg1: memref<8x2x128xf32, #tpu.memory_space<vmem>>, %arg2: memref<8x128xf32, #tpu.memory_space<vmem>>, %arg3: memref<8x2x128xf32, #tpu.memory_space<vmem>>) attributes {dimension_semantics = [#tpu.dimension_semantics<parallel>], iteration_bounds = array<i64: 1>, scalar_prefetch = 0 : i64, scratch_operands = 0 : i64, tpu.core_type = #tpu.core_type<tc>, window_params = [{transform_indices = @transform_0, window_bounds = array<i64: 8, 2, 128>}, {transform_indices = @transform_1, window_bounds = array<i64: 8, 128>}, {transform_indices = @transform_2, window_bounds = array<i64: 8, 2, 128>}]} {
    %c0 = arith.constant 0 : index
    %c0_0 = arith.constant 0 : index
    %c0_1 = arith.constant 0 : index
    %0 = vector.load %arg1[%c0, %c0_0, %c0_1] : memref<8x2x128xf32, #tpu.memory_space<vmem>>, vector<8x2x128xf32>
    %c0_2 = arith.constant 0 : index
    %c0_3 = arith.constant 0 : index
    %1 = vector.load %arg2[%c0_2, %c0_3] : memref<8x128xf32, #tpu.memory_space<vmem>>, vector<8x128xf32>
    %2 = vector.shape_cast %1 : vector<8x128xf32> to vector<8x1x128xf32>
    %3 = vector.broadcast %2 : vector<8x1x128xf32> to vector<8x2x128xf32>
    %4 = arith.addf %0, %3 : vector<8x2x128xf32>
    %c0_4 = arith.constant 0 : index
    %c0_5 = arith.constant 0 : index
    %c0_6 = arith.constant 0 : index
    %5 = vector.load %arg3[%c0_4, %c0_5, %c0_6] : memref<8x2x128xf32, #tpu.memory_space<vmem>>, vector<8x2x128xf32>
    tpu.vector_store %arg3[%c0_4, %c0_5, %c0_6], %4 {strides = array<i32>} : memref<8x2x128xf32, #tpu.memory_space<vmem>>, vector<8x2x128xf32>,
    return
  }
  func.func @transform_0(%arg0: i32) -> (i32, i32, i32) {
    %c0_i32 = arith.constant 0 : i32
    %c0_i32_0 = arith.constant 0 : i32
    %c0_i32_1 = arith.constant 0 : i32
    return %arg0, %c0_i32, %c0_i32_0 : i32, i32, i32
  }
  func.func @transform_1(%arg0: i32) -> (i32, i32) {
    %c0_i32 = arith.constant 0 : i32
    %c0_i32_0 = arith.constant 0 : i32
    return %arg0, %c0_i32 : i32, i32
  }
  func.func @transform_2(%arg0: i32) -> (i32, i32, i32) {
    %c0_i32 = arith.constant 0 : i32
    %c0_i32_0 = arith.constant 0 : i32
    %c0_i32_1 = arith.constant 0 : i32
    return %arg0, %c0_i32, %c0_i32_0 : i32, i32, i32
  }
}

</mosaic_0001>

<bundles_post_ra>
// kernel: tpu_custom_call.1
= control target key start
LH: loop header
LB: loop body
LE: loop exit
PB: predicated region body
PF: predicated region fallthrough
CT: control target
= control target key end

     0   :  { %7 = vsyncpa [#allocation3], 0  ;;  %s280_s0 = inlined_call_operand.hbm [shape: f32[8,2,128], index: 0, kind: input, shape index: {}]   ;;  %s281_s1 = inlined_call_operand.hbm [shape: f32[8,128], index: 1, kind: input, shape index: {}]   ;;  %s282_s2 = inlined_call_operand.hbm [shape: f32[8,2,128], index: 2, kind: output, shape index: {}]  }
   0x1   :  { %8 = vsyncpa [#allocation6], 0 }
   0x2   :  { %9 = vsyncpa [#allocation4], 0  ;;  %s244_s9 = smov [#allocation2]  }
   0x3   :  { %s15_s10 = sshll.u32 %s244_s9, 4  ;;  %s16_s10 = int_to_ptr.vmem [resolvable:$true] %s15_s10 }
   0x4   :  { %s186_s11 = scalar_lea.vmem %s16_s10, 256  ;;  %p191_p1 = scmp.lt.s32.totalorder %s16_s10, %s16_s10 }
   0x5   :  { %p187_p0 = scmp.ne.s32.totalorder %s16_s10, %s186_s11  ;;  %p192_p2 = scmp.lt.s32.totalorder %s186_s11, %s186_s11 }
   0x7   :  { %p193_p3 = por %p192_p2, %p191_p1 }
   0x9   :  { %p194_p4 = pnand %p193_p3, %p187_p0 }
   0xb   :  { %197 = shalt.err (!%p194_p4)
}
   0xc   :  { %s245_s12 = smov 32   ;;  %s246_s13 = smov 2  }
   0xd   :  { %21 = dma.hbm_to_vmem [thread:$0]  %s280_s0, 256, %s16_s10, [#allocation3], %s245_s12, %s245_s12, %s246_s13  }
   0xe   :  { %s247_s16 = smov [#allocation5]  }
   0xf   :  { %s28_s17 = sshll.u32 %s247_s16, 4  ;;  %s29_s17 = int_to_ptr.vmem [resolvable:$true] %s28_s17 }
  0x10   :  { %s206_s18 = scalar_lea.vmem %s29_s17, 128  ;;  %p211_p6 = scmp.lt.s32.totalorder %s29_s17, %s29_s17 }
  0x11   :  { %p207_p5 = scmp.ne.s32.totalorder %s29_s17, %s206_s18  ;;  %p212_p7 = scmp.lt.s32.totalorder %s206_s18, %s206_s18 }
  0x13   :  { %p213_p8 = por %p212_p7, %p211_p6 }
  0x15   :  { %p214_p9 = pnand %p213_p8, %p207_p5 }
  0x17   :  { %217 = shalt.err (!%p214_p9)
}
  0x18   :  { %31 = dma.hbm_to_vmem [thread:$0]  %s281_s1, 128, %s29_s17, [#allocation6]  }
  0x19   :  { %238 = dma.done.wait [#allocation3], 256  }
  0x1a   :  { %239 = vsyncadd [#allocation3], 4294967040 }
  0x1b   :  { %240 = dma.done.wait [#allocation6], 128  }
  0x1c   :  { %241 = vsyncadd [#allocation6], 4294967168  ;;  %v52_v0 = vlaneseq  ;;  %v248_v1 = vmov 1966171168   ;;  %v46_v6 = vld [vmem:[#allocation5] sm:$0xff]  ;;  %s249_s0 = smov [#allocation7]  }
  0x1d   :  { %v50_v2 = vunpack.c.l.s4 %v248_v1  ;;  %v48_v9 = vcombine.high %v46_v6, %v46_v6  ;;  %v38_v13 = vld [vmem:[#allocation2] sm:$0x3]  ;;  %v39_v18 = vld [vmem:[#allocation2 + $0x2] sm:$0x3]  ;;  %v40_v19 = vld [vmem:[#allocation2 + $0x4] sm:$0x3] }
  0x1e   :  { %v53_v3 = vshrl.u32 %v52_v0, 7  ;;  %v42_v25 = vld [vmem:[#allocation2 + $0x8] sm:$0x3]  ;;  %v41_v26 = vld [vmem:[#allocation2 + $0x6] sm:$0x3]  ;;  %s158_s1 = sshll.u32 %s249_s0, 4  ;;  %s159_s1 = int_to_ptr.vmem [resolvable:$true] %s158_s1 }
  0x1f   :  { %v51_v4 = vunpack.c.0.s8 %v50_v2  ;;  %v43_v33 = vld [vmem:[#allocation2 + $0xa] sm:$0x3]  ;;  %v44_v34 = vld [vmem:[#allocation2 + $0xc] sm:$0x3]  ;;  %v45_v40 = vld [vmem:[#allocation2 + $0xe] sm:$0x3]  ;;  %p223_p11 = scmp.lt.s32.totalorder %s159_s1, %s159_s1 }
  0x20   :  { %v99_v8 = vsub.s32 0, %v53_v3  ;;  %s218_s21 = scalar_lea.vmem %s159_s1, 256 }
  0x21   :  { %v54_v5 = vsub.s32 %v51_v4, %v53_v3  ;;  %p219_p10 = scmp.ne.s32.totalorder %s159_s1, %s218_s21  ;;  %p224_p12 = scmp.lt.s32.totalorder %s218_s21, %s218_s21 }
  0x23   :  { %v55_v7 = vrot.slane %v46_v6, %v54_v5  ;;  %v62_v12 = vrot.slane %v48_v9, %v54_v5  ;;  %p225_p13 = por %p224_p12, %p223_p11 }
  0x25   :  { %v71_v10 = vrot.slane %v55_v7, %v54_v5  ;;  %v63_v11 = vcombine.high %v55_v7, %v55_v7  ;;  %v78_v17 = vrot.slane %v62_v12, %v54_v5  ;;  %v64_v20 = vcombine.high %v62_v12, %v62_v12  ;;  %p226_p0 = pnand %p225_p13, %p219_p10 }
  0x27   :  { %v100_v14 = vrot.slane %v71_v10, %v99_v8  ;;  %v85_v15 = vrot.slane %v63_v11, %v54_v5  ;;  %v93_v16 = vcombine.high %v71_v10, %v71_v10  ;;  %v116_v27 = vrot.slane %v78_v17, %v99_v8 }
  0x28   :  { %v92_v28 = vrot.slane %v64_v20, %v54_v5  ;;  %v94_v29 = vcombine.high %v78_v17, %v78_v17 }
  0x29   :  { %v137_v21 = vadd.f32 %v100_v14, %v38_v13  ;;  %v104_v22 = vrot.slane %v85_v15, %v99_v8  ;;  %v108_v23 = vrot.slane %v93_v16, %v99_v8  ;;  %v95_v24 = vcombine.high %v85_v15, %v85_v15 }
  0x2a   :  { %v141_v35 = vadd.f32 %v116_v27, %v42_v25  ;;  %v120_v36 = vrot.slane %v92_v28, %v99_v8  ;;  %v124_v37 = vrot.slane %v94_v29, %v99_v8  ;;  %v96_v38 = vcombine.high %v92_v28, %v92_v28 }
  0x2b   :  { %145 = vst [vmem:[#allocation7] sm:$0x3] %v137_v21  ;;  %v138_v30 = vadd.f32 %v104_v22, %v39_v18  ;;  %v139_v31 = vadd.f32 %v108_v23, %v40_v19  ;;  %v112_v32 = vrot.slane %v95_v24, %v99_v8 }
  0x2c   :  { %149 = vst [vmem:[#allocation7 + $0x8] sm:$0x3] %v141_v35  ;;  %v142_v41 = vadd.f32 %v120_v36, %v43_v33  ;;  %v143_v42 = vadd.f32 %v124_v37, %v44_v34  ;;  %v128_v43 = vrot.slane %v96_v38, %v99_v8 }
  0x2d   :  { %146 = vst [vmem:[#allocation7 + $0x2] sm:$0x3] %v138_v30  ;;  %147 = vst [vmem:[#allocation7 + $0x4] sm:$0x3] %v139_v31  ;;  %v140_v39 = vadd.f32 %v112_v32, %v41_v26 }
  0x2e   :  { %150 = vst [vmem:[#allocation7 + $0xa] sm:$0x3] %v142_v41  ;;  %151 = vst [vmem:[#allocation7 + $0xc] sm:$0x3] %v143_v42  ;;  %v144_v44 = vadd.f32 %v128_v43, %v45_v40 }
  0x2f   :  { %148 = vst [vmem:[#allocation7 + $0x6] sm:$0x3] %v140_v39 }
  0x30   :  { %152 = vst [vmem:[#allocation7 + $0xe] sm:$0x3] %v144_v44 }
  0x31   :  { %229 = shalt.err (!%p226_p0)
}
  0x32   :  { %164 = dma.vmem_to_hbm [thread:$0]  %s159_s1, 256, %s282_s2, [#allocation4], %s245_s12, %s245_s12, %s246_s13  }
  0x33   :  { %242 = dma.done.wait [#allocation4], 256  }
  0x34   :  { %243 = vsyncadd [#allocation4], 4294967040 }
  0x35   :  { %168 = vsyncpa [#allocation3], 1 }
  0x36   :  { %169 = vsyncpa [#allocation6], 1 }
  0x37   :  { %170 = vsyncpa [#allocation4], 1 }

</bundles_post_ra>
